<compile_context>
chip_gen: v6e
topology: v6e:2x2x1
jax: 0.10.0
libtpu: 0.0.40
codegen_flags: <defaults>
</compile_context>

<pallas_src>
import functools

import jax
import jax.numpy as jnp
from jax.experimental import pallas as pl
from jax.experimental.pallas import tpu as pltpu


LANE = 128
SUBLANE = 8


def _round_up(x: int, m: int) -> int:
    return ((x + m - 1) // m) * m


# ---------------------------------------------------------------------------
# Fused MLP kernel: every layer inside one kernel body.
# ---------------------------------------------------------------------------
def _mlp_fused_kernel(x_ref, w_ref, b_ref, o_ref, *, num_layers: int):
    # x_ref: (tm, P) f32 row tile
    # w_ref: (L, P, P) bf16, lane-padded, VMEM resident across the grid
    # b_ref: (L, 1, P) f32, VMEM resident
    # o_ref: (tm, P) f32
    h = x_ref[...].astype(jnp.bfloat16)          # bf16 feeds the MXU
    y = None
    for layer in range(num_layers):              # static unroll over layers
        y = jnp.dot(h, w_ref[layer], preferred_element_type=jnp.float32)
        y = y + b_ref[layer]                     # f32 epilogue (v5e-safe)
        if layer < num_layers - 1:
            y = jnp.maximum(y, 0.0)
            h = y.astype(jnp.bfloat16)
    o_ref[...] = y.astype(o_ref.dtype)


# ---------------------------------------------------------------------------
# Parameter init (deterministic, PyTorch-default-style uniform) + packing
# ---------------------------------------------------------------------------
def init_mlp_params(key, input_dim, hidden_dim, output_dim, num_layers):
    h = [hidden_dim] * (num_layers - 1)
    in_dims = [input_dim] + h
    out_dims = h + [output_dim]
    params = []
    for n_in, n_out in zip(in_dims, out_dims):
        key, kw, kb = jax.random.split(key, 3)
        bound = 1.0 / float(n_in) ** 0.5
        # Stored already transposed: (n_in, n_out) so the kernel does x @ W.
        w = jax.random.uniform(kw, (n_in, n_out), jnp.float32, -bound, bound)
        b = jax.random.uniform(kb, (n_out,), jnp.float32, -bound, bound)
        params.append((w, b))
    return params


def _pack_params(params, pad_dim):
    """Stack all layer weights/biases into lane-padded resident slabs."""
    num_layers = len(params)
    w_stack = jnp.zeros((num_layers, pad_dim, pad_dim), jnp.bfloat16)
    b_stack = jnp.zeros((num_layers, 1, pad_dim), jnp.float32)
    for layer, (w, b) in enumerate(params):
        k, n = w.shape
        w_stack = w_stack.at[layer, :k, :n].set(w.astype(jnp.bfloat16))
        b_stack = b_stack.at[layer, 0, :n].set(b.astype(jnp.float32))
    return w_stack, b_stack


# ---------------------------------------------------------------------------
# Forward
# ---------------------------------------------------------------------------
def mlp_forward(params, x, *, max_tm=512):
    """x: (..., input_dim) -> (..., output_dim), matching PyTorch semantics."""
    lead_shape = x.shape[:-1]
    in_dim = x.shape[-1]
    out_dim = params[-1][0].shape[1]
    num_layers = len(params)

    # One uniform, lane-dense padded feature width for every layer.
    all_dims = [in_dim] + [w.shape[1] for w, _ in params]
    pad_dim = _round_up(max(all_dims), LANE)

    # Flatten leading dims, pad rows to a tile multiple and features to P.
    x2d = x.reshape(-1, in_dim)
    m = x2d.shape[0]
    tm = min(max_tm, _round_up(m, SUBLANE))
    m_pad = _round_up(max(m, tm), tm)
    x_pad = jnp.zeros((m_pad, pad_dim), x.dtype).at[:m, :in_dim].set(x2d)

    w_stack, b_stack = _pack_params(params, pad_dim)

    grid = (m_pad // tm,)
    kernel = functools.partial(_mlp_fused_kernel, num_layers=num_layers)

    flops = 2 * m_pad * pad_dim * pad_dim * num_layers
    bytes_accessed = (
        2 * m_pad * pad_dim * 4                      # x in + out (f32)
        + num_layers * pad_dim * pad_dim * 2         # weights (bf16)
        + num_layers * pad_dim * 4                   # biases (f32)
    )

    out_pad = pl.pallas_call(
        kernel,
        out_shape=jax.ShapeDtypeStruct((m_pad, pad_dim), x.dtype),
        grid=grid,
        in_specs=[
            pl.BlockSpec((tm, pad_dim), lambda i: (i, 0)),
            pl.BlockSpec((num_layers, pad_dim, pad_dim), lambda i: (0, 0, 0)),
            pl.BlockSpec((num_layers, 1, pad_dim), lambda i: (0, 0, 0)),
        ],
        out_specs=pl.BlockSpec((tm, pad_dim), lambda i: (i, 0)),
        compiler_params=pltpu.CompilerParams(
            dimension_semantics=("parallel",),
            vmem_limit_bytes=32 * 1024 * 1024,
        ),
        cost_estimate=pl.CostEstimate(
            flops=flops, transcendentals=0, bytes_accessed=bytes_accessed
        ),
    )(x_pad, w_stack, b_stack)

    return out_pad[:m, :out_dim].reshape(*lead_shape, out_dim)


# ---------------------------------------------------------------------------
# Reference (pure JAX, same bf16-matmul / f32-accumulate numerics)
# ---------------------------------------------------------------------------
def mlp_reference(params, x):
    num_layers = len(params)
    h = x
    for i, (w, b) in enumerate(params):
        y = jnp.dot(
            h.astype(jnp.bfloat16),
            w.astype(jnp.bfloat16),
            preferred_element_type=jnp.float32,
        ) + b
        if i < num_layers - 1:
            y = jnp.maximum(y, 0.0)
        h = y
    return h


if __name__ == "__main__":
    # MLP(input_dim=32, hidden_dim=32, output_dim=16, num_layers=3) applied to
    # x of shape (batch=2, seq=8, 32) — same small shapes as the module spec.
    input_dim, hidden_dim, output_dim, num_layers = 32, 32, 16, 3
    batch, seq = 2, 8

    key = jax.random.PRNGKey(0)
    key, kx = jax.random.split(key)
    x = jax.random.normal(kx, (batch, seq, input_dim), jnp.float32)

    params = init_mlp_params(key, input_dim, hidden_dim, output_dim, num_layers)

    out = mlp_forward(params, x)
    out = jax.block_until_ready(out)

    ref = mlp_reference(params, x)
    assert out.shape == (batch, seq, output_dim), out.shape
    assert jnp.allclose(out, ref, atol=1e-3, rtol=1e-3), "mismatch vs reference"

    print("KERNEL_OK")
</pallas_src>

<mosaic_0001>
module attributes {stable_mosaic.version = 11 : i64} {
  func.func @_mlp_fused_kernel(%arg0: i32, %arg1: memref<16x128xf32, #tpu.memory_space<vmem>>, %arg2: memref<3x128x128xbf16, #tpu.memory_space<vmem>>, %arg3: memref<3x1x128xf32, #tpu.memory_space<vmem>>, %arg4: memref<16x128xf32, #tpu.memory_space<vmem>>) attributes {dimension_semantics = [#tpu.dimension_semantics<parallel>], iteration_bounds = array<i64: 1>, scalar_prefetch = 0 : i64, scratch_operands = 0 : i64, tpu.core_type = #tpu.core_type<tc>, window_params = [{transform_indices = @transform_0, window_bounds = array<i64: 16, 128>}, {pipeline_mode = #tpu.pipeline_mode<synchronous>, transform_indices = @transform_1, window_bounds = array<i64: 3, 128, 128>}, {pipeline_mode = #tpu.pipeline_mode<synchronous>, transform_indices = @transform_2, window_bounds = array<i64: 3, 1, 128>}, {transform_indices = @transform_3, window_bounds = array<i64: 16, 128>}]} {
    %c0 = arith.constant 0 : index
    %c0_0 = arith.constant 0 : index
    %0 = vector.load %arg1[%c0, %c0_0] : memref<16x128xf32, #tpu.memory_space<vmem>>, vector<16x128xf32>
    %1 = arith.truncf %0 : vector<16x128xf32> to vector<16x128xbf16>
    %c0_1 = arith.constant 0 : index
    %c0_2 = arith.constant 0 : index
    %c0_3 = arith.constant 0 : index
    %2 = vector.load %arg2[%c0_1, %c0_2, %c0_3] : memref<3x128x128xbf16, #tpu.memory_space<vmem>>, vector<1x128x128xbf16>
    %3 = vector.shape_cast %2 : vector<1x128x128xbf16> to vector<128x128xbf16>
    %cst = arith.constant dense<0.000000e+00> : vector<16x128xf32>
    %4 = tpu.matmul %1, %3, %cst {dimension_numbers = #tpu.dot_dimension_numbers<[1], [0], [0], [1], [0, 0, 1, 1], [], []>} : vector<16x128xbf16>, vector<128x128xbf16>, vector<16x128xf32> -> vector<16x128xf32>
    %c0_4 = arith.constant 0 : index
    %c0_5 = arith.constant 0 : index
    %c0_6 = arith.constant 0 : index
    %5 = vector.load %arg3[%c0_4, %c0_5, %c0_6] : memref<3x1x128xf32, #tpu.memory_space<vmem>>, vector<1x1x128xf32>
    %6 = vector.shape_cast %5 : vector<1x1x128xf32> to vector<1x128xf32>
    %7 = vector.broadcast %6 : vector<1x128xf32> to vector<16x128xf32>
    %8 = arith.addf %4, %7 : vector<16x128xf32>
    %cst_7 = arith.constant 0.000000e+00 : f32
    %9 = vector.broadcast %cst_7 : f32 to vector<16x128xf32>
    %10 = arith.maximumf %8, %9 : vector<16x128xf32>
    %11 = arith.truncf %10 : vector<16x128xf32> to vector<16x128xbf16>
    %c1 = arith.constant 1 : index
    %c0_8 = arith.constant 0 : index
    %c0_9 = arith.constant 0 : index
    %12 = vector.load %arg2[%c1, %c0_8, %c0_9] : memref<3x128x128xbf16, #tpu.memory_space<vmem>>, vector<1x128x128xbf16>
    %13 = vector.shape_cast %12 : vector<1x128x128xbf16> to vector<128x128xbf16>
    %cst_10 = arith.constant dense<0.000000e+00> : vector<16x128xf32>
    %14 = tpu.matmul %11, %13, %cst_10 {dimension_numbers = #tpu.dot_dimension_numbers<[1], [0], [0], [1], [0, 0, 1, 1], [], []>} : vector<16x128xbf16>, vector<128x128xbf16>, vector<16x128xf32> -> vector<16x128xf32>
    %c1_11 = arith.constant 1 : index
    %c0_12 = arith.constant 0 : index
    %c0_13 = arith.constant 0 : index
    %15 = vector.load %arg3[%c1_11, %c0_12, %c0_13] : memref<3x1x128xf32, #tpu.memory_space<vmem>>, vector<1x1x128xf32>
    %16 = vector.shape_cast %15 : vector<1x1x128xf32> to vector<1x128xf32>
    %17 = vector.broadcast %16 : vector<1x128xf32> to vector<16x128xf32>
    %18 = arith.addf %14, %17 : vector<16x128xf32>
    %cst_14 = arith.constant 0.000000e+00 : f32
    %19 = vector.broadcast %cst_14 : f32 to vector<16x128xf32>
    %20 = arith.maximumf %18, %19 : vector<16x128xf32>
    %21 = arith.truncf %20 : vector<16x128xf32> to vector<16x128xbf16>
    %c2 = arith.constant 2 : index
    %c0_15 = arith.constant 0 : index
    %c0_16 = arith.constant 0 : index
    %22 = vector.load %arg2[%c2, %c0_15, %c0_16] : memref<3x128x128xbf16, #tpu.memory_space<vmem>>, vector<1x128x128xbf16>
    %23 = vector.shape_cast %22 : vector<1x128x128xbf16> to vector<128x128xbf16>
    %cst_17 = arith.constant dense<0.000000e+00> : vector<16x128xf32>
    %24 = tpu.matmul %21, %23, %cst_17 {dimension_numbers = #tpu.dot_dimension_numbers<[1], [0], [0], [1], [0, 0, 1, 1], [], []>} : vector<16x128xbf16>, vector<128x128xbf16>, vector<16x128xf32> -> vector<16x128xf32>
    %c2_18 = arith.constant 2 : index
    %c0_19 = arith.constant 0 : index
    %c0_20 = arith.constant 0 : index
    %25 = vector.load %arg3[%c2_18, %c0_19, %c0_20] : memref<3x1x128xf32, #tpu.memory_space<vmem>>, vector<1x1x128xf32>
    %26 = vector.shape_cast %25 : vector<1x1x128xf32> to vector<1x128xf32>
    %27 = vector.broadcast %26 : vector<1x128xf32> to vector<16x128xf32>
    %28 = arith.addf %24, %27 : vector<16x128xf32>
    %c0_21 = arith.constant 0 : index
    %c0_22 = arith.constant 0 : index
    %29 = vector.load %arg4[%c0_21, %c0_22] : memref<16x128xf32, #tpu.memory_space<vmem>>, vector<16x128xf32>
    tpu.vector_store %arg4[%c0_21, %c0_22], %28 {strides = array<i32>} : memref<16x128xf32, #tpu.memory_space<vmem>>, vector<16x128xf32>,
    return
  }
  func.func @transform_0(%arg0: i32) -> (i32, i32) {
    %c0_i32 = arith.constant 0 : i32
    %c0_i32_0 = arith.constant 0 : i32
    return %arg0, %c0_i32 : i32, i32
  }
  func.func @transform_1(%arg0: i32) -> (i32, i32, i32) {
    %c0_i32 = arith.constant 0 : i32
    %c0_i32_0 = arith.constant 0 : i32
    %c0_i32_1 = arith.constant 0 : i32
    %c0_i32_2 = arith.constant 0 : i32
    return %c0_i32, %c0_i32_0, %c0_i32_1 : i32, i32, i32
  }
  func.func @transform_2(%arg0: i32) -> (i32, i32, i32) {
    %c0_i32 = arith.constant 0 : i32
    %c0_i32_0 = arith.constant 0 : i32
    %c0_i32_1 = arith.constant 0 : i32
    %c0_i32_2 = arith.constant 0 : i32
    return %c0_i32, %c0_i32_0, %c0_i32_1 : i32, i32, i32
  }
  func.func @transform_3(%arg0: i32) -> (i32, i32) {
    %c0_i32 = arith.constant 0 : i32
    %c0_i32_0 = arith.constant 0 : i32
    return %arg0, %c0_i32 : i32, i32
  }
}

</mosaic_0001>

<bundles_post_ra>
// kernel: tpu_custom_call.1
= control target key start
LH: loop header
LB: loop body
LE: loop exit
PB: predicated region body
PF: predicated region fallthrough
CT: control target
= control target key end

     0   :  { %8 = vsyncpa [#allocation3], 0  ;;  %s711_s0 = inlined_call_operand.hbm [shape: f32[16,128], index: 0, kind: input, shape index: {}]   ;;  %s712_s1 = inlined_call_operand.hbm [shape: bf16[3,128,128], index: 1, kind: input, shape index: {}]   ;;  %s713_s2 = inlined_call_operand.vmem [shape: f32[3,1,128], index: 2, kind: input, shape index: {}]   ;;  %s714_s3 = inlined_call_operand.hbm [shape: f32[16,128], index: 3, kind: output, shape index: {}]  }
   0x1   :  { %9 = vsyncpa [#allocation6], 0 }
   0x2   :  { %10 = vsyncpa [#allocation4], 0  ;;  %s628_s12 = smov [#allocation2]  }
   0x3   :  { %s16_s13 = sshll.u32 %s628_s12, 4  ;;  %s17_s13 = int_to_ptr.vmem [resolvable:$true] %s16_s13 }
   0x4   :  { %s570_s14 = scalar_lea.vmem %s17_s13, 256  ;;  %p575_p1 = scmp.lt.s32.totalorder %s17_s13, %s17_s13 }
   0x5   :  { %p571_p0 = scmp.ne.s32.totalorder %s17_s13, %s570_s14  ;;  %p576_p2 = scmp.lt.s32.totalorder %s570_s14, %s570_s14 }
   0x7   :  { %p577_p3 = por %p576_p2, %p575_p1 }
   0x9   :  { %p578_p4 = pnand %p577_p3, %p571_p0 }
   0xb   :  { %581 = shalt.err (!%p578_p4)
}
   0xc   :  { %s629_s15 = smov 128   ;;  %s630_s16 = smov 8  }
   0xd   :  { %22 = dma.hbm_to_vmem [thread:$0]  %s711_s0, 256, %s17_s13, [#allocation3], %s629_s15, %s629_s15, %s630_s16  }
   0xe   :  { %s631_s19 = smov [#allocation5]  }
   0xf   :  { %s28_s20 = sshll.u32 %s631_s19, 4  ;;  %s29_s20 = int_to_ptr.vmem [resolvable:$true] %s28_s20 }
  0x10   :  { %s590_s21 = scalar_lea.vmem %s29_s20, 3072  ;;  %p595_p6 = scmp.lt.s32.totalorder %s29_s20, %s29_s20 }
  0x11   :  { %p591_p5 = scmp.ne.s32.totalorder %s29_s20, %s590_s21  ;;  %p596_p7 = scmp.lt.s32.totalorder %s590_s21, %s590_s21 }
  0x13   :  { %p597_p8 = por %p596_p7, %p595_p6 }
  0x15   :  { %p598_p9 = pnand %p597_p8, %p591_p5 }
  0x17   :  { %601 = shalt.err (!%p598_p9)
}
  0x18   :  { %s632_s22 = smov 64   ;;  %s633_s23 = smov 4  }
  0x19   :  { %34 = dma.hbm_to_vmem [thread:$0]  %s712_s1, 3072, %s29_s20, [#allocation6], %s632_s22, %s632_s22, %s633_s23  }
  0x1a   :  { %622 = dma.done.wait [#allocation3], 256  }
  0x1b   :  { %623 = vsyncadd [#allocation3], 4294967040 }
  0x1c   :  { %624 = dma.done.wait [#allocation6], 3072  }
  0x1d   :  { %625 = vsyncadd [#allocation6], 4294964224  ;;  %v634_v0 = vmov 0.0   ;;  %vm635_vm0 = vmmov 0   ;;  %v538_v1 = vld [vmem:[#allocation5 + $0x38] sm:$0xff]   ;;  %v539_v2 = vld [vmem:[#allocation5 + $0x30] sm:$0xff]  }
  0x1e   :  { %469 = vmatprep.subr.bf16.mxu0 %v634_v0  ;;  %485 = vmatprep.mubr.msk.bf16.mxu0 %vm635_vm0, %v634_v0  ;;  %v540_v3 = vld [vmem:[#allocation5 + $0x28] sm:$0xff]   ;;  %v546_v4 = vld [vmem:[#allocation5 + $0x78] sm:$0xff]   ;;  %v541_v5 = vld [vmem:[#allocation5 + $0x20] sm:$0xff]   ;;  %s636_s30 = smov [#allocation7]  }
  0x1f   :  { %489 = vmatprep.subr.bf16.mxu1 %v634_v0  ;;  %505 = vmatprep.mubr.msk.bf16.mxu1 %vm635_vm0, %v634_v0  ;;  %v547_v6 = vld [vmem:[#allocation5 + $0x70] sm:$0xff]   ;;  %v542_v7 = vld [vmem:[#allocation5 + $0x18] sm:$0xff]   ;;  %v548_v8 = vld [vmem:[#allocation5 + $0x68] sm:$0xff]   ;;  %s400_s4 = sshll.u32 %s636_s30, 4  ;;  %s401_s4 = int_to_ptr.vmem [resolvable:$true] %s400_s4 }
  0x20   :  { %470 = vmatpush3.bf16.msra.mxu0 %v538_v1  ;;  %490 = vmatpush3.bf16.msra.mxu1 %v546_v4  ;;  %v543_v9 = vld [vmem:[#allocation5 + $0x10] sm:$0xff]   ;;  %v549_v10 = vld [vmem:[#allocation5 + $0x60] sm:$0xff]   ;;  %v544_v11 = vld [vmem:[#allocation5 + $0x8] sm:$0xff]   ;;  %s602_s5 = scalar_lea.vmem %s401_s4, 256  ;;  %p607_p11 = scmp.lt.s32.totalorder %s401_s4, %s401_s4 }
  0x21   :  { %471 = vmatprep.subr.bf16.mxu0 %v634_v0  ;;  %491 = vmatprep.subr.bf16.mxu1 %v634_v0  ;;  %v550_v12 = vld [vmem:[#allocation5 + $0x58] sm:$0xff]   ;;  %v545_v13 = vld [vmem:[#allocation5] sm:$0xff]   ;;  %v44_v14 = vld [vmem:[#allocation2] sm:$0xff]  ;;  %p603_p10 = scmp.ne.s32.totalorder %s401_s4, %s602_s5  ;;  %p608_p12 = scmp.lt.s32.totalorder %s602_s5, %s602_s5 }
  0x22   :  { %v45_v15 = vld [vmem:[#allocation2 + $0x8] sm:$0xff]  ;;  %v551_v17 = vld [vmem:[#allocation5 + $0x50] sm:$0xff]   ;;  %v552_v18 = vld [vmem:[#allocation5 + $0x48] sm:$0xff]  }
  0x23   :  { %v46_v16 = vpack.c.bf16 %v45_v15, %v44_v14  ;;  %v553_v19 = vld [vmem:[#allocation5 + $0x40] sm:$0xff]   ;;  %v554_v20 = vld [vmem:[#allocation5 + $0xb8] sm:$0xff]   ;;  %v555_v21 = vld [vmem:[#allocation5 + $0xb0] sm:$0xff]   ;;  %p609_p13 = por %p608_p12, %p607_p11 }
  0x24   :  { %472 = vmatpush3.bf16.msra.mxu0 %v539_v2  ;;  %492 = vmatpush3.bf16.msra.mxu1 %v547_v6  ;;  %v556_v22 = vld [vmem:[#allocation5 + $0xa8] sm:$0xff]   ;;  %v557_v23 = vld [vmem:[#allocation5 + $0xa0] sm:$0xff]   ;;  %v558_v24 = vld [vmem:[#allocation5 + $0x98] sm:$0xff]  }
  0x25   :  { %473 = vmatprep.subr.bf16.mxu0 %v634_v0  ;;  %493 = vmatprep.subr.bf16.mxu1 %v634_v0  ;;  %v413_v25 = vld [vmem:[%s713_s2] ss:$0 sm:$0xff]  ;;  %v560_v36 = vld [vmem:[#allocation5 + $0x88] sm:$0xff]   ;;  %v561_v37 = vld [vmem:[#allocation5 + $0x80] sm:$0xff]   ;;  %p610_p0 = pnand %p609_p13, %p603_p10 }
  0x26   :  { %v559_v35 = vld [vmem:[#allocation5 + $0x90] sm:$0xff]  }
  0x27   :  { %v423_v38 = vld [vmem:[%s713_s2 + $0x1] ss:$0 sm:$0xff]  ;;  %v433_v48 = vld [vmem:[%s713_s2 + $0x2] ss:$0 sm:$0xff] }
  0x28   :  { %474 = vmatpush3.bf16.msra.mxu0 %v540_v3  ;;  %494 = vmatpush3.bf16.msra.mxu1 %v548_v8 }
  0x29   :  { %475 = vmatprep.subr.bf16.mxu0 %v634_v0  ;;  %495 = vmatprep.subr.bf16.mxu1 %v634_v0 }
  0x2c   :  { %476 = vmatpush3.bf16.msra.mxu0 %v541_v5  ;;  %496 = vmatpush3.bf16.msra.mxu1 %v549_v10 }
  0x2d   :  { %477 = vmatprep.subr.bf16.mxu0 %v634_v0  ;;  %497 = vmatprep.subr.bf16.mxu1 %v634_v0 }
  0x30   :  { %478 = vmatpush3.bf16.msra.mxu0 %v542_v7  ;;  %498 = vmatpush3.bf16.msra.mxu1 %v550_v12 }
  0x31   :  { %479 = vmatprep.subr.bf16.mxu0 %v634_v0  ;;  %499 = vmatprep.subr.bf16.mxu1 %v634_v0 }
  0x34   :  { %480 = vmatpush3.bf16.msra.mxu0 %v543_v9  ;;  %500 = vmatpush3.bf16.msra.mxu1 %v551_v17 }
  0x35   :  { %481 = vmatprep.subr.bf16.mxu0 %v634_v0  ;;  %501 = vmatprep.subr.bf16.mxu1 %v634_v0 }
  0x38   :  { %482 = vmatpush3.bf16.msra.mxu0 %v544_v11  ;;  %502 = vmatpush3.bf16.msra.mxu1 %v552_v18 }
  0x39   :  { %483 = vmatprep.subr.bf16.mxu0 %v634_v0  ;;  %503 = vmatprep.subr.bf16.mxu1 %v634_v0 }
  0x3c   :  { %484 = vmatpush3.bf16.msra.mxu0 %v545_v13  ;;  %504 = vmatpush3.bf16.msra.mxu1 %v553_v19 }
  0x3d   :  { %509 = vmatprep.subr.bf16.mxu0 %v634_v0 }
  0x3f   :  { %486 = vmatmul.mubr.bf16.vlgmr.msra.gmra.mxu0 %v46_v16 }
  0x40   :  { %525 = vmatprep.mubr.msk.bf16.mxu0 %vm635_vm0, %v634_v0  ;;  %510 = vmatpush3.bf16.msra.mxu0 %v554_v20 }
  0x41   :  { %511 = vmatprep.subr.bf16.mxu0 %v634_v0 }
  0x44   :  { %512 = vmatpush3.bf16.msra.mxu0 %v555_v21 }
  0x45   :  { %513 = vmatprep.subr.bf16.mxu0 %v634_v0 }
  0x48   :  { %514 = vmatpush3.bf16.msra.mxu0 %v556_v22 }
  0x49   :  { %515 = vmatprep.subr.bf16.mxu0 %v634_v0 }
  0x4c   :  { %516 = vmatpush3.bf16.msra.mxu0 %v557_v23 }
  0x4d   :  { %517 = vmatprep.subr.bf16.mxu0 %v634_v0 }
  0x50   :  { %518 = vmatpush3.bf16.msra.mxu0 %v558_v24 }
  0x51   :  { %519 = vmatprep.subr.bf16.mxu0 %v634_v0 }
  0x54   :  { %520 = vmatpush3.bf16.msra.mxu0 %v559_v35 }
  0x55   :  { %521 = vmatprep.subr.bf16.mxu0 %v634_v0 }
  0x58   :  { %522 = vmatpush3.bf16.msra.mxu0 %v560_v36 }
  0x59   :  { %523 = vmatprep.subr.bf16.mxu0 %v634_v0 }
  0x5c   :  { %524 = vmatpush3.bf16.msra.mxu0 %v561_v37 }
  0xff   :  { %v152_v26 = vpop.f32.mrf.mxu0 }
 0x100   :  { %v153_v28 = vadd.f32 %v413_v25, %v152_v26 }
 0x101   :  { %v487_v27 = vpop.f32.mrf.mxu0 }
 0x102   :  { %v159_v32 = vmax.f32 %v153_v28, 0.0 }
 0x103   :  { %v155_v29 = vpop.f32.mrf.mxu0 }
 0x104   :  { %v156_v30 = vadd.f32 %v413_v25, %v155_v29 }
 0x105   :  { %v488_v31 = vpop.f32.mrf.mxu0 }
 0x106   :  { %v160_v33 = vmax.f32 %v156_v30, 0.0 }
 0x108   :  { %v161_v34 = vpack.c.bf16 %v160_v33, %v159_v32 }
 0x10a   :  { %506 = vmatmul.mubr.bf16.vlgmr.msra.gmra.mxu1 %v161_v34 }
 0x1ca   :  { %v269_v39 = vpop.f32.mrf.mxu1 }
 0x1cb   :  { %v270_v41 = vadd.f32 %v423_v38, %v269_v39 }
 0x1cc   :  { %v507_v40 = vpop.f32.mrf.mxu1 }
 0x1cd   :  { %v276_v45 = vmax.f32 %v270_v41, 0.0 }
 0x1ce   :  { %v272_v42 = vpop.f32.mrf.mxu1 }
 0x1cf   :  { %v273_v43 = vadd.f32 %v423_v38, %v272_v42 }
 0x1d0   :  { %v508_v44 = vpop.f32.mrf.mxu1 }
 0x1d1   :  { %v277_v46 = vmax.f32 %v273_v43, 0.0 }
 0x1d3   :  { %v278_v47 = vpack.c.bf16 %v277_v46, %v276_v45 }
 0x1d5   :  { %526 = vmatmul.mubr.bf16.vlgmr.msra.gmra.mxu0 %v278_v47 }
 0x295   :  { %v386_v49 = vpop.f32.mrf.mxu0 }
 0x296   :  { %v387_v50 = vadd.f32 %v433_v48, %v386_v49 }
 0x297   :  { %v527_v51 = vpop.f32.mrf.mxu0 }
 0x298   :  { %393 = vst [vmem:[#allocation7] sm:$0xff] %v387_v50 }
 0x299   :  { %v389_v52 = vpop.f32.mrf.mxu0 }
 0x29a   :  { %v390_v53 = vadd.f32 %v433_v48, %v389_v52 }
 0x29b   :  { %v528_v54 = vpop.f32.mrf.mxu0 }
 0x29c   :  { %394 = vst [vmem:[#allocation7 + $0x8] sm:$0xff] %v390_v53 }
 0x29d   :  { %613 = shalt.err (!%p610_p0)
}
 0x29e   :  { %406 = dma.vmem_to_hbm [thread:$0]  %s401_s4, 256, %s714_s3, [#allocation4], %s629_s15, %s629_s15, %s630_s16  }
 0x29f   :  { %626 = dma.done.wait [#allocation4], 256  }
 0x2a0   :  { %627 = vsyncadd [#allocation4], 4294967040 }
 0x2a1   :  { %410 = vsyncpa [#allocation3], 1 }
 0x2a2   :  { %411 = vsyncpa [#allocation6], 1 }
 0x2a3   :  { %412 = vsyncpa [#allocation4], 1 }

</bundles_post_ra>
